<compile_context>
chip_gen: v7x
topology: tpu7x:2x2x1
jax: 0.10.0
libtpu: 0.0.40
codegen_flags: <defaults>
</compile_context>

<pallas_src>
import functools

import jax
import jax.numpy as jnp
import numpy as np
from jax.experimental import pallas as pl
from jax.experimental.pallas import tpu as pltpu


def _encoder_kernel(src_ref, scale_mat_ref, weight_t_ref, gw_col_ref, out_ref,
                    *, tile_j):
    """Per-batch-block kernel.

    src_ref:       (TB, S, E)  block of src_emb rows
    scale_mat_ref: (E, E)      self.scale_matrix
    weight_t_ref:  (E, E)      self.weight transposed: weight_t[j, i] = weight[i, j]
    gw_col_ref:    (E, 1)      self.global_weight as a column vector
    out_ref:       (TB, E)     result block
    """
    tb, e = out_ref.shape

    # Mean over the sequence axis (sublane reduce) -> (TB, E); E stays on lanes.
    x = jnp.mean(src_ref[...].astype(jnp.float32), axis=1)

    # scale[b, i] = sum_j scale_matrix[i, j] * x[b, j]
    # One batched MXU matmul; i lands on lanes, matching the output layout.
    scale = jax.lax.dot_general(
        x, scale_mat_ref[...],
        (((1,), (1,)), ((), ())),
        preferred_element_type=jnp.float32)                    # (TB, E)

    # result[b, i] = sum_j weight[i, j] * sigmoid(scale[b, i] * gw[j]) * x[b, j]
    # j-tiled contraction over the *sublane* axis: per chunk build a
    # (TB, TJ, E) product (j on sublanes, i on lanes) and reduce over sublanes
    # into an f32 (TB, E) accumulator. Fully unrolled with static slices.
    n_chunks = e // tile_j
    acc = jnp.zeros((tb, e), jnp.float32)
    for c in range(n_chunks):
        j0 = c * tile_j
        w_c = weight_t_ref[j0:j0 + tile_j, :]                  # (TJ, E)
        gw_c = gw_col_ref[j0:j0 + tile_j, :]                   # (TJ, 1)
        x_c = x[:, j0:j0 + tile_j]                             # (TB, TJ)
        z = scale[:, None, :] * gw_c[None, :, :]               # (TB, TJ, E)
        # sigmoid(z) with a single EUP transcendental (tanh) per element.
        sig = 0.5 * (1.0 + jnp.tanh(0.5 * z))
        prod = (w_c[None, :, :] * sig) * x_c[:, :, None]       # (TB, TJ, E)
        acc = acc + jnp.sum(prod, axis=1)                      # sublane reduce

    out_ref[...] = acc.astype(out_ref.dtype)


def _pick_j_tile(E):
    """Width of one j chunk of the final contraction."""
    if E <= 128:
        return E
    if E % 128 == 0:
        return 128
    # Ragged E (uncommon): fall back to a single chunk.
    return E


def _vmem_limit_bytes():
    """Scoped-VMEM limit to request: physical capacity with headroom."""
    cap = 64 * 1024 * 1024                      # safe floor (v7x physical VMEM)
    try:
        info = pltpu.get_tpu_info()
        cap = int(getattr(info, "vmem_capacity_bytes", cap) or cap)
    except Exception:
        pass
    return min(int(cap * 0.75), 96 * 1024 * 1024)


def _pick_batch_block(B, S, E, tile_j, budget_bytes):
    """VMEM-aware batch tile. Caller pads B up to a multiple of the result."""

    def footprint(tb):
        return 4 * (2 * tb * S * E              # double-buffered src block
                    + 2 * 2 * E * E             # scale_matrix + weight.T buffers
                    + 2 * E                     # global_weight column
                    + tb * E * tile_j           # per-j-chunk product (vregs/spill)
                    + tb * E                    # f32 accumulator
                    + 2 * tb * E)               # double-buffered output block

    if B < 16:
        return B        # one full block; too small to split into 8-row tiles.
    # Multi-block: TB must be a multiple of 8 (output-block tiling rule).
    # Start from half the batch so the grid has >= 2 "parallel" steps (lets a
    # v7x megacore shard the batch axis); shrink until the footprint fits.
    tb = min(512, max(8, (B // 2 // 8) * 8))
    while tb > 8 and footprint(tb) > budget_bytes:
        tb = max(8, (tb // 2 // 8) * 8)
    return tb


def encoder_forward(src_emb, src_emb_2, weight, scale_matrix, global_weight):
    """src_emb: [B, S, E] float32; src_emb_2 is unused (parity with PyTorch)."""
    del src_emb_2  # unused by the PyTorch forward as well
    B, S, E = src_emb.shape

    tile_j = _pick_j_tile(E)
    vmem_limit = _vmem_limit_bytes()
    TB = _pick_batch_block(B, S, E, tile_j, budget_bytes=int(vmem_limit * 0.7))

    padded_B = pl.cdiv(B, TB) * TB
    if padded_B != B:
        src_emb = jnp.pad(src_emb, ((0, padded_B - B), (0, 0), (0, 0)))
    num_blocks = padded_B // TB

    weight_t = jnp.transpose(weight)             # one-time wrapper transpose
    gw_col = global_weight.reshape(E, 1)

    out = pl.pallas_call(
        functools.partial(_encoder_kernel, tile_j=tile_j),
        out_shape=jax.ShapeDtypeStruct((padded_B, E), jnp.float32),
        grid_spec=pltpu.PrefetchScalarGridSpec(
            num_scalar_prefetch=0,
            grid=(num_blocks,),
            in_specs=[
                pl.BlockSpec((TB, S, E), lambda b: (b, 0, 0)),   # src_emb block
                pl.BlockSpec((E, E), lambda b: (0, 0)),          # scale_matrix
                pl.BlockSpec((E, E), lambda b: (0, 0)),          # weight.T
                pl.BlockSpec((E, 1), lambda b: (0, 0)),          # global_weight col
            ],
            out_specs=pl.BlockSpec((TB, E), lambda b: (b, 0)),
        ),
        compiler_params=pltpu.CompilerParams(
            dimension_semantics=("parallel",),
            vmem_limit_bytes=vmem_limit),
    )(src_emb, scale_matrix, weight_t, gw_col)

    return out if padded_B == B else out[:B]


def encoder_forward_ref(src_emb, weight, scale_matrix, global_weight):
    """Pure-JAX reference mirroring the PyTorch forward."""
    x = jnp.mean(src_emb, axis=1)                                # [B, E]
    scale = jnp.einsum("ij,bj->bi", scale_matrix, x)             # [B, E]
    new_w = jax.nn.sigmoid(scale[:, :, None] * global_weight[None, None, :])
    new_w = weight[None, :, :] * new_w                           # [B, E, E]
    return jnp.einsum("bij,bj->bi", new_w, x)                    # [B, E]


if __name__ == "__main__":
    # Small, forward-consistent shapes:
    #   embed_dim_1 (E) = 32, batch B = 2, sequence S = 8
    B, S, E = 2, 8, 32
    key = jax.random.PRNGKey(0)
    k_src, k_src2, k_w, k_sm, k_gw = jax.random.split(key, 5)

    src_emb = jax.random.normal(k_src, (B, S, E), dtype=jnp.float32)
    src_emb_2 = jax.random.normal(k_src2, (B, S, E), dtype=jnp.float32)

    # Deterministic parameter init (shapes from __init__):
    #   weight, scale_matrix: [E, E] (kaiming_uniform-style range)
    #   global_weight: [E] uniform(-1/sqrt(E), 1/sqrt(E))
    bound_w = float(np.sqrt(6.0 / (1.0 + 5.0) / E))   # kaiming_uniform(a=sqrt(5))
    weight = jax.random.uniform(k_w, (E, E), jnp.float32, -bound_w, bound_w)
    scale_matrix = jax.random.uniform(k_sm, (E, E), jnp.float32, -bound_w, bound_w)
    bound_g = 1.0 / float(np.sqrt(E))
    global_weight = jax.random.uniform(k_gw, (E,), jnp.float32, -bound_g, bound_g)

    out = encoder_forward(src_emb, src_emb_2, weight, scale_matrix, global_weight)
    out = jax.block_until_ready(out)

    ref = encoder_forward_ref(src_emb, weight, scale_matrix, global_weight)
    np.testing.assert_allclose(np.asarray(out), np.asarray(ref),
                               rtol=2e-5, atol=2e-5)
    print("KERNEL_OK")
</pallas_src>

<mosaic_0001>
module attributes {stable_mosaic.version = 11 : i64} {
  func.func @_encoder_kernel(%arg0: i32, %arg1: memref<2x8x32xf32, #tpu.memory_space<vmem>>, %arg2: memref<32x32xf32, #tpu.memory_space<vmem>>, %arg3: memref<32x32xf32, #tpu.memory_space<vmem>>, %arg4: memref<32x1xf32, #tpu.memory_space<vmem>>, %arg5: memref<2x32xf32, #tpu.memory_space<vmem>>) attributes {dimension_semantics = [#tpu.dimension_semantics<parallel>], iteration_bounds = array<i64: 1>, scalar_prefetch = 0 : i64, scratch_operands = 0 : i64, tpu.core_type = #tpu.core_type<tc>, window_params = [{transform_indices = @transform_0, window_bounds = array<i64: 2, 8, 32>}, {pipeline_mode = #tpu.pipeline_mode<synchronous>, transform_indices = @transform_1, window_bounds = array<i64: 32, 32>}, {pipeline_mode = #tpu.pipeline_mode<synchronous>, transform_indices = @transform_2, window_bounds = array<i64: 32, 32>}, {pipeline_mode = #tpu.pipeline_mode<synchronous>, transform_indices = @transform_3, window_bounds = array<i64: 32, 1>}, {transform_indices = @transform_4, window_bounds = array<i64: 2, 32>}]} {
    %c0 = arith.constant 0 : index
    %c0_0 = arith.constant 0 : index
    %c0_1 = arith.constant 0 : index
    %0 = vector.load %arg1[%c0, %c0_0, %c0_1] : memref<2x8x32xf32, #tpu.memory_space<vmem>>, vector<2x8x32xf32>
    %cst = arith.constant dense<0.000000e+00> : vector<2x32xf32>
    %1 = vector.multi_reduction <add>, %0, %cst [1] : vector<2x8x32xf32> to vector<2x32xf32>
    %cst_2 = arith.constant 8.000000e+00 : f32
    %2 = vector.broadcast %cst_2 : f32 to vector<2x32xf32>
    %3 = arith.divf %1, %2 : vector<2x32xf32>
    %c0_3 = arith.constant 0 : index
    %c0_4 = arith.constant 0 : index
    %4 = vector.load %arg2[%c0_3, %c0_4] : memref<32x32xf32, #tpu.memory_space<vmem>>, vector<32x32xf32>
    %cst_5 = arith.constant dense<0.000000e+00> : vector<2x32xf32>
    %5 = tpu.matmul %3, %4, %cst_5 {dimension_numbers = #tpu.dot_dimension_numbers<[1], [1], [0], [0], [0, 0, 1, 0], [], []>} : vector<2x32xf32>, vector<32x32xf32>, vector<2x32xf32> -> vector<2x32xf32>
    %cst_6 = arith.constant 0.000000e+00 : f32
    %6 = vector.broadcast %cst_6 : f32 to vector<2x32xf32>
    %c0_7 = arith.constant 0 : index
    %c0_8 = arith.constant 0 : index
    %7 = vector.load %arg3[%c0_7, %c0_8] : memref<32x32xf32, #tpu.memory_space<vmem>>, vector<32x32xf32>
    %c0_9 = arith.constant 0 : index
    %c0_10 = arith.constant 0 : index
    %8 = vector.load %arg4[%c0_9, %c0_10] : memref<32x1xf32, #tpu.memory_space<vmem>>, vector<32x1xf32>
    %9 = vector.shape_cast %5 : vector<2x32xf32> to vector<2x1x32xf32>
    %10 = vector.shape_cast %8 : vector<32x1xf32> to vector<1x32x1xf32>
    %11 = vector.broadcast %9 : vector<2x1x32xf32> to vector<2x32x32xf32>
    %12 = vector.broadcast %10 : vector<1x32x1xf32> to vector<2x32x32xf32>
    %13 = arith.mulf %11, %12 : vector<2x32x32xf32>
    %cst_11 = arith.constant 5.000000e-01 : f32
    %14 = vector.broadcast %cst_11 : f32 to vector<2x32x32xf32>
    %15 = arith.mulf %14, %13 : vector<2x32x32xf32>
    %16 = math.tanh %15 : vector<2x32x32xf32>
    %cst_12 = arith.constant 1.000000e+00 : f32
    %17 = vector.broadcast %cst_12 : f32 to vector<2x32x32xf32>
    %18 = arith.addf %17, %16 : vector<2x32x32xf32>
    %cst_13 = arith.constant 5.000000e-01 : f32
    %19 = vector.broadcast %cst_13 : f32 to vector<2x32x32xf32>
    %20 = arith.mulf %19, %18 : vector<2x32x32xf32>
    %21 = vector.shape_cast %7 : vector<32x32xf32> to vector<1x32x32xf32>
    %22 = vector.broadcast %21 : vector<1x32x32xf32> to vector<2x32x32xf32>
    %23 = arith.mulf %22, %20 : vector<2x32x32xf32>
    %24 = vector.shape_cast %3 : vector<2x32xf32> to vector<2x32x1xf32>
    %25 = vector.broadcast %24 : vector<2x32x1xf32> to vector<2x32x32xf32>
    %26 = arith.mulf %23, %25 : vector<2x32x32xf32>
    %cst_14 = arith.constant dense<0.000000e+00> : vector<2x32xf32>
    %27 = vector.multi_reduction <add>, %26, %cst_14 [1] : vector<2x32x32xf32> to vector<2x32xf32>
    %28 = arith.addf %6, %27 : vector<2x32xf32>
    %c0_15 = arith.constant 0 : index
    %c0_16 = arith.constant 0 : index
    %29 = vector.load %arg5[%c0_15, %c0_16] : memref<2x32xf32, #tpu.memory_space<vmem>>, vector<2x32xf32>
    tpu.vector_store %arg5[%c0_15, %c0_16], %28 {strides = array<i32>} : memref<2x32xf32, #tpu.memory_space<vmem>>, vector<2x32xf32>,
    return
  }
  func.func @transform_0(%arg0: i32) -> (i32, i32, i32) {
    %c0_i32 = arith.constant 0 : i32
    %c0_i32_0 = arith.constant 0 : i32
    %c0_i32_1 = arith.constant 0 : i32
    return %arg0, %c0_i32, %c0_i32_0 : i32, i32, i32
  }
  func.func @transform_1(%arg0: i32) -> (i32, i32) {
    %c0_i32 = arith.constant 0 : i32
    %c0_i32_0 = arith.constant 0 : i32
    %c0_i32_1 = arith.constant 0 : i32
    return %c0_i32, %c0_i32_0 : i32, i32
  }
  func.func @transform_2(%arg0: i32) -> (i32, i32) {
    %c0_i32 = arith.constant 0 : i32
    %c0_i32_0 = arith.constant 0 : i32
    %c0_i32_1 = arith.constant 0 : i32
    return %c0_i32, %c0_i32_0 : i32, i32
  }
  func.func @transform_3(%arg0: i32) -> (i32, i32) {
    %c0_i32 = arith.constant 0 : i32
    %c0_i32_0 = arith.constant 0 : i32
    %c0_i32_1 = arith.constant 0 : i32
    return %c0_i32, %c0_i32_0 : i32, i32
  }
  func.func @transform_4(%arg0: i32) -> (i32, i32) {
    %c0_i32 = arith.constant 0 : i32
    %c0_i32_0 = arith.constant 0 : i32
    return %arg0, %c0_i32 : i32, i32
  }
}

</mosaic_0001>

<bundles_post_ra>
// kernel: tpu_custom_call.1
= control target key start
LH: loop header
LB: loop body
LE: loop exit
PB: predicated region body
PF: predicated region fallthrough
CT: control target
= control target key end

     0   :  { %9 = vsyncpa [#allocation3], 0  ;;  %s602_s0 = inlined_call_operand.hbm [shape: f32[2,8,32], index: 0, kind: input, shape index: {}]   ;;  %s603_s1 = inlined_call_operand.vmem [shape: f32[32,32], index: 1, kind: input, shape index: {}]   ;;  %s604_s2 = inlined_call_operand.hbm [shape: f32[32,32], index: 2, kind: input, shape index: {}]   ;;  %s605_s3 = inlined_call_operand.vmem [shape: f32[32,1], index: 3, kind: input, shape index: {}]   ;;  %s606_s4 = inlined_call_operand.hbm [shape: f32[2,32], index: 4, kind: output, shape index: {}]  }
   0x1   :  { %10 = vsyncpa [#allocation6], 0 }
   0x2   :  { %11 = vsyncpa [#allocation4], 0  ;;  %s484_s15 = smov [#allocation2]   ;;  %s412_s19 = scalar_lea.hbm %s602_s0, 256 }
   0x3   :  { %s17_s16 = sshll.u32 %s484_s15, 4  ;;  %p413_p0 = scmp.ne.s32.totalorder %s602_s0, %s412_s19  ;;  %s18_s16 = int_to_ptr.vmem [resolvable:$true] %s17_s16 }
   0x4   :  { %p416_p1 = scmp.lt.u32.totalorder %s412_s19, %s602_s0 }
   0x6   :  { %p418_p2 = pnand %p416_p1, %p413_p0 }
   0x8   :  { %421 = shalt.err (!%p418_p2)
}
   0x9   :  { %s422_s24 = scalar_lea.vmem %s18_s16, 256  ;;  %p427_p4 = scmp.lt.s32.totalorder %s18_s16, %s18_s16 }
   0xa   :  { %p423_p3 = scmp.ne.s32.totalorder %s18_s16, %s422_s24  ;;  %p428_p5 = scmp.lt.s32.totalorder %s422_s24, %s422_s24 }
   0xc   :  { %p429_p6 = por %p428_p5, %p427_p4 }
   0xe   :  { %p430_p7 = pnand %p429_p6, %p423_p3 }
  0x10   :  { %433 = shalt.err (!%p430_p7)
}
  0x11   :  { %s485_s25 = smov 128   ;;  %s486_s26 = smov 8  }
  0x12   :  { %23 = dma.hbm_to_vmem [thread:$0]  %s602_s0, 256, %s18_s16, [#allocation3], %s485_s25, %s485_s25, %s486_s26  }
  0x13   :  { %s487_s29 = smov [#allocation5]   ;;  %s434_s7 = scalar_lea.hbm %s604_s2, 512 }
  0x14   :  { %s31_s30 = sshll.u32 %s487_s29, 4  ;;  %p435_p8 = scmp.ne.s32.totalorder %s604_s2, %s434_s7  ;;  %s32_s30 = int_to_ptr.vmem [resolvable:$true] %s31_s30 }
  0x15   :  { %p438_p9 = scmp.lt.u32.totalorder %s434_s7, %s604_s2 }
  0x17   :  { %p440_p10 = pnand %p438_p9, %p435_p8 }
  0x19   :  { %443 = shalt.err (!%p440_p10)
}
  0x1a   :  { %s444_s12 = scalar_lea.vmem %s32_s30, 512  ;;  %p449_p12 = scmp.lt.s32.totalorder %s32_s30, %s32_s30 }
  0x1b   :  { %p445_p11 = scmp.ne.s32.totalorder %s32_s30, %s444_s12  ;;  %p450_p13 = scmp.lt.s32.totalorder %s444_s12, %s444_s12 }
  0x1d   :  { %p451_p0 = por %p450_p13, %p449_p12 }
  0x1f   :  { %p452_p1 = pnand %p451_p0, %p445_p11 }
  0x21   :  { %455 = shalt.err (!%p452_p1)
}
  0x22   :  { %37 = dma.hbm_to_vmem [thread:$0]  %s604_s2, 512, %s32_s30, [#allocation6], %s485_s25, %s485_s25, %s486_s26  }
  0x23   :  { %478 = dma.done.wait [#allocation3], 256  }
  0x24   :  { %479 = vsyncadd [#allocation3], 4294967040 }
  0x25   :  { %480 = dma.done.wait [#allocation6], 512  }
  0x26   :  { %481 = vsyncadd [#allocation6], 4294966784  ;;  %v488_v0 = vmov 0.0|0.0   ;;  %vm489_vm0 = vmmov 0   ;;  %v490_v1 = vmov 0.0   ;;  %v491_v2 = vmov 0  }
  0x27   :  { %376 = vmatprep.subr.bf16.mxu0 %v488_v0  ;;  %373 = vmatprep.mubr.msk.f32.mxu0 %vm489_vm0, %v490_v1  ;;  %vm48_vm1 = vcmask 261120   ;;  %v66_v3 = vld [vmem:[%s603_s1] sm:$0xff]  ;;  %v67_v4 = vld [vmem:[%s603_s1 + $0x8] sm:$0xff]  ;;  %v164_v12 = vld [vmem:[%s605_s3 + $0x10] sm:$0xff]  ;;  %vm72_vm3 = vcmask 1041409   ;;  %v170_v35 = vlaneseq  ;;  %vm337_vm4 = vcmask 254976  }
  0x28   :  { %394 = vset.pattern.permute.xlu0 %v491_v2  ;;  %395 = vset.pattern.permute.xlu1 %v491_v2  ;;  %vm551_vm2 = vmpackc.low %vm48_vm1, %vm48_vm1  ;;  %v377_v6 = vpack.c.bf16 %v67_v4, %v66_v3  ;;  %v46_v7 = vld [vmem:[#allocation2] sm:$0xff]  ;;  %v47_v8 = vld [vmem:[#allocation2 + $0x8] sm:$0xff]  ;;  %v492_v33 = vmov 1966171168  }
  0x29   :  { %v49_v9 = vsel %vm48_vm1, %v46_v7, 0.0  ;;  %v56_v10 = vsel %vm48_vm1, %v47_v8, 0.0  ;;  %v162_v11 = vld [vmem:[%s605_s3] sm:$0xff]  ;;  %v68_v15 = vld [vmem:[%s603_s1 + $0x10] sm:$0xff]  ;;  %v69_v16 = vld [vmem:[%s603_s1 + $0x18] sm:$0xff]  ;;  %211 = vperm.xlu1 %395, %v164_v12   ;;  %v168_v34 = vunpack.c.l.s4 %v492_v33  ;;  %v171_v37 = vshrl.u32 %v170_v35, 7 }
  0x2a   :  { %379 = vmatpush3.bf16.xpose.msk.msra.mxu0 %vm551_vm2, %v377_v6  ;;  %v50_v13 = vrot.slane %v49_v9, 4  ;;  %v57_v14 = vrot.slane %v56_v10, 4  ;;  %201 = vperm.xlu0 %394, %v162_v11   ;;  %v163_v17 = vld [vmem:[%s605_s3 + $0x8] sm:$0xff]  ;;  %v165_v20 = vld [vmem:[%s605_s3 + $0x18] sm:$0xff]  ;;  %v381_v21 = vpack.c.bf16 %v69_v16, %v68_v15  ;;  %v158_v33 = vld [vmem:[#allocation5] sm:$0xff]  ;;  %s493_s1 = smov [#allocation7]  }
  0x2b   :  { %380 = vmatprep.subr.bf16.mxu0 %v488_v0  ;;  %v169_v36 = vunpack.c.0.s8 %v168_v34  ;;  %v191_v43 = vsub.s32 0, %v171_v37  ;;  %s345_s3 = sshll.u32 %s493_s1, 4  ;;  %s346_s3 = int_to_ptr.vmem [resolvable:$true] %s345_s3 }
  0x2c   :  { %v51_v18 = vadd.f32 %v50_v13, %v49_v9  ;;  %v58_v19 = vadd.f32 %v57_v14, %v56_v10  ;;  %v159_v14 = vld [vmem:[#allocation5 + $0x8] sm:$0xff]  ;;  %s456_s29 = scalar_lea.vmem %s346_s3, 32  ;;  %p461_p3 = scmp.lt.s32.totalorder %s346_s3, %s346_s3 }
  0x2d   :  { %216 = vperm.xlu1 %395, %v165_v20   ;;  %v172_v38 = vsub.s32 %v169_v36, %v171_v37  ;;  %v161_v36 = vld [vmem:[#allocation5 + $0x18] sm:$0xff]  ;;  %p457_p2 = scmp.ne.s32.totalorder %s346_s3, %s456_s29  ;;  %p462_p4 = scmp.lt.s32.totalorder %s456_s29, %s456_s29 }
  0x2e   :  { %v52_v22 = vrot.slane %v51_v18, 2  ;;  %v59_v23 = vrot.slane %v58_v19, 2  ;;  %206 = vperm.xlu0 %394, %v163_v17  }
  0x2f   :  { %p463_p5 = por %p462_p4, %p461_p3 }
  0x30   :  { %v53_v24 = vadd.f32 %v52_v22, %v51_v18  ;;  %v60_v25 = vadd.f32 %v59_v23, %v58_v19 }
  0x31   :  { %p464_p6 = pnand %p463_p5, %p457_p2 }
  0x32   :  { %383 = vmatpush3.bf16.xpose.msk.msra.mxu0 %vm551_vm2, %v381_v21  ;;  %v54_v26 = vrot.slane %v53_v24, 1  ;;  %v61_v27 = vrot.slane %v60_v25, 1 }
  0x34   :  { %v55_v28 = vadd.f32 %v54_v26, %v53_v24  ;;  %v62_v29 = vadd.f32 %v61_v27, %v60_v25  ;;  %v160_v25 = vld [vmem:[#allocation5 + $0x10] sm:$0xff] }
  0x36   :  { %v64_v30 = vmul.f32 0.125, %v55_v28  ;;  %v65_v31 = vmul.f32 0.125, %v62_v29 }
  0x38   :  { %v73_v32 = vsel %vm72_vm3, %v65_v31, %v64_v30  ;;  %268 = vbcast.lane.b32.xlu0 %v64_v30, 256  ;;  %272 = vbcast.lane.b32.xlu1 %v64_v30, 264 }
  0x39   :  { %374 = vmatmul.mubr.msk.f32.vlgmr.msra.gmra.mrb[0].mxu0 %vm48_vm1, %v73_v32 }
  0x3c   :  { %283 = vbcast.lane.b32.xlu0 %v65_v31, 256  ;;  %287 = vbcast.lane.b32.xlu1 %v65_v31, 264 }
  0x40   :  { %276 = vbcast.lane.b32.xlu0 %v64_v30, 272  ;;  %291 = vbcast.lane.b32.xlu1 %v65_v31, 272 }
  0x44   :  { %280 = vbcast.lane.b32.xlu0 %v64_v30, 280  ;;  %295 = vbcast.lane.b32.xlu1 %v65_v31, 280 }
  0xa8   :  { %v212_v39 = vpop.permute.xlu1 %211 }
  0xa9   :  { %v202_v40 = vpop.permute.xlu0 %201 }
  0xac   :  { %v217_v47 = vpop.permute.xlu1 %216 }
  0xad   :  { %v207_v50 = vpop.permute.xlu0 %206 }
  0xb0   :  { %v273_v5 = vpop.permute.xlu1 %272 }
  0xb1   :  { %v269_v4 = vpop.permute.xlu0 %268 }
  0xb4   :  { %v288_v9 = vpop.permute.xlu1 %287 }
  0xb5   :  { %v284_v7 = vpop.permute.xlu0 %283 }
  0xb8   :  { %v292_v31 = vpop.permute.xlu1 %291 }
  0xb9   :  { %v277_v26 = vpop.permute.xlu0 %276 }
 0x10c   :  { %v154_v41 = vpop.f32.mrb[0].mxu0 }
 0x10d   :  { %v173_v42 = vrot.slane %v154_v41, %v172_v38  ;;  %v375_v44 = vpop.f32.mrb[1].mxu0 }
 0x10f   :  { %v174_v45 = vcombine.high %v173_v42, %v173_v42  ;;  %v181_v46 = vrot.slane %v173_v42, %v172_v38 }
 0x111   :  { %v188_v48 = vrot.slane %v174_v45, %v172_v38  ;;  %v192_v49 = vrot.slane %v181_v46, %v191_v43 }
 0x113   :  { %v196_v51 = vrot.slane %v188_v48, %v191_v43  ;;  %v221_v52 = vmul.f32 %v212_v39, %v192_v49  ;;  %v220_v53 = vmul.f32 %v207_v50, %v192_v49  ;;  %v222_v54 = vmul.f32 %v217_v47, %v192_v49 }
 0x114   :  { %v219_v55 = vmul.f32 %v202_v40, %v192_v49 }
 0x115   :  { %v225_v56 = vmul.f32 %v212_v39, %v196_v51  ;;  %v229_v57 = vmul.f32 0.5, %v221_v52  ;;  %v224_v58 = vmul.f32 %v207_v50, %v196_v51  ;;  %v228_v59 = vmul.f32 0.5, %v220_v53  ;;  %v296_v52 = vpop.permute.xlu1 %295 }
 0x116   :  { %v226_v60 = vmul.f32 %v217_v47, %v196_v51  ;;  %v223_v61 = vmul.f32 %v202_v40, %v196_v51  ;;  %v230_v0 = vmul.f32 0.5, %v222_v54  ;;  %v227_v2 = vmul.f32 0.5, %v219_v55  ;;  %v281_v47 = vpop.permute.xlu0 %280 }
 0x117   :  { %v233_v62 = vmul.f32 0.5, %v225_v56  ;;  %396 = vtanh.f32 %v229_v57  ;;  %v232_v63 = vmul.f32 0.5, %v224_v58 }
 0x118   :  { %398 = vtanh.f32 %v228_v59  ;;  %v234_v1 = vmul.f32 0.5, %v226_v60  ;;  %v231_v3 = vmul.f32 0.5, %v223_v61 }
 0x119   :  { %400 = vtanh.f32 %v233_v62 }
 0x11a   :  { %402 = vtanh.f32 %v232_v63 }
 0x11b   :  { %404 = vtanh.f32 %v230_v0 }
 0x11c   :  { %406 = vtanh.f32 %v234_v1 }
 0x11d   :  { %408 = vtanh.f32 %v227_v2 }
 0x11e   :  { %410 = vtanh.f32 %v231_v3 }
 0x121   :  { %v397_v6 = vpop.eup %396 }
 0x122   :  { %v399_v8 = vpop.eup %398  ;;  %v245_v10 = vadd.f32 1.0, %v397_v6 }
 0x123   :  { %v401_v11 = vpop.eup %400  ;;  %v244_v12 = vadd.f32 1.0, %v399_v8 }
 0x124   :  { %v403_v13 = vpop.eup %402  ;;  %v249_v15 = vadd.f32 1.0, %v401_v11  ;;  %v253_v20 = vmul.f32 0.5, %v245_v10 }
 0x125   :  { %v405_v16 = vpop.eup %404  ;;  %v252_v17 = vmul.f32 0.5, %v244_v12  ;;  %v248_v18 = vadd.f32 1.0, %v403_v13 }
 0x126   :  { %v407_v19 = vpop.eup %406  ;;  %v246_v21 = vadd.f32 1.0, %v405_v16  ;;  %v257_v27 = vmul.f32 0.5, %v249_v15  ;;  %v261_v40 = vmul.f32 %v253_v20, %v160_v25 }
 0x127   :  { %v409_v22 = vpop.eup %408  ;;  %v260_v23 = vmul.f32 %v252_v17, %v159_v14  ;;  %v256_v24 = vmul.f32 0.5, %v248_v18  ;;  %v250_v28 = vadd.f32 1.0, %v407_v19 }
 0x128   :  { %v411_v29 = vpop.eup %410  ;;  %v243_v30 = vadd.f32 1.0, %v409_v22  ;;  %v254_v32 = vmul.f32 0.5, %v246_v21  ;;  %v265_v43 = vmul.f32 %v257_v27, %v160_v25  ;;  %v299_v51 = vmul.f32 %v277_v26, %v261_v40 }
 0x129   :  { %v247_v34 = vadd.f32 1.0, %v411_v29  ;;  %v264_v35 = vmul.f32 %v256_v24, %v159_v14  ;;  %v258_v37 = vmul.f32 0.5, %v250_v28  ;;  %v298_v39 = vmul.f32 %v273_v5, %v260_v23 }
 0x12a   :  { %v251_v38 = vmul.f32 0.5, %v243_v30  ;;  %v262_v45 = vmul.f32 %v254_v32, %v161_v36  ;;  %v303_v55 = vmul.f32 %v292_v31, %v265_v43  ;;  %v308_v62 = vsel %vm48_vm1, %v299_v51, 0.0 }
 0x12b   :  { %v255_v41 = vmul.f32 0.5, %v247_v34  ;;  %v302_v42 = vmul.f32 %v288_v9, %v264_v35  ;;  %v266_v48 = vmul.f32 %v258_v37, %v161_v36  ;;  %v306_v50 = vsel %vm48_vm1, %v298_v39, 0.0 }
 0x12c   :  { %v259_v44 = vmul.f32 %v251_v38, %v158_v33  ;;  %v300_v57 = vmul.f32 %v281_v47, %v262_v45  ;;  %v321_v0 = vsel %vm48_vm1, %v303_v55, 0.0 }
 0x12d   :  { %v263_v46 = vmul.f32 %v255_v41, %v158_v33  ;;  %v319_v54 = vsel %vm48_vm1, %v302_v42, 0.0  ;;  %v304_v60 = vmul.f32 %v296_v52, %v266_v48 }
 0x12e   :  { %v297_v49 = vmul.f32 %v269_v4, %v259_v44  ;;  %v310_v2 = vsel %vm48_vm1, %v300_v57, 0.0 }
 0x12f   :  { %v301_v53 = vmul.f32 %v284_v7, %v263_v46  ;;  %v323_v4 = vsel %vm48_vm1, %v304_v60, 0.0 }
 0x130   :  { %v305_v56 = vsel %vm48_vm1, %v297_v49, 0.0 }
 0x131   :  { %v307_v58 = vadd.f32 %v306_v50, %v305_v56  ;;  %v318_v59 = vsel %vm48_vm1, %v301_v53, 0.0 }
 0x132   :  { %v320_v61 = vadd.f32 %v319_v54, %v318_v59 }
 0x133   :  { %v309_v63 = vadd.f32 %v308_v62, %v307_v58 }
 0x134   :  { %v322_v1 = vadd.f32 %v321_v0, %v320_v61 }
 0x135   :  { %v311_v3 = vadd.f32 %v310_v2, %v309_v63 }
 0x136   :  { %v324_v5 = vadd.f32 %v323_v4, %v322_v1 }
 0x137   :  { %v312_v6 = vrot.slane %v311_v3, 4 }
 0x138   :  { %v325_v7 = vrot.slane %v324_v5, 4 }
 0x139   :  { %v313_v8 = vadd.f32 %v312_v6, %v311_v3 }
 0x13a   :  { %v326_v9 = vadd.f32 %v325_v7, %v324_v5 }
 0x13b   :  { %v314_v10 = vrot.slane %v313_v8, 2 }
 0x13c   :  { %v327_v11 = vrot.slane %v326_v9, 2 }
 0x13d   :  { %v315_v12 = vadd.f32 %v314_v10, %v313_v8 }
 0x13e   :  { %v328_v13 = vadd.f32 %v327_v11, %v326_v9 }
 0x13f   :  { %v316_v14 = vrot.slane %v315_v12, 1 }
 0x140   :  { %v329_v15 = vrot.slane %v328_v13, 1 }
 0x141   :  { %v317_v16 = vadd.f32 %v316_v14, %v315_v12 }
 0x142   :  { %v330_v17 = vadd.f32 %v329_v15, %v328_v13 }
 0x144   :  { %v335_v18 = vsel %vm72_vm3, %v330_v17, %v317_v16 }
 0x145   :  { %338 = vst.msk [vmem:[#allocation7] sm:$0x3] %vm337_vm4, %v335_v18 }
 0x146   :  { %467 = shalt.err (!%p464_p6)
}
 0x147   :  { %s468_s6 = scalar_lea.hbm %s606_s4, 32 }
 0x148   :  { %p469_p7 = scmp.ne.s32.totalorder %s606_s4, %s468_s6  ;;  %p472_p8 = scmp.lt.u32.totalorder %s468_s6, %s606_s4 }
 0x14a   :  { %p474_p9 = pnand %p472_p8, %p469_p7 }
 0x14c   :  { %477 = shalt.err (!%p474_p9)
}
 0x14d   :  { %348 = dma.vmem_to_hbm [thread:$0]  %s346_s3, 32, %s606_s4, [#allocation4]  }
 0x14e   :  { %482 = dma.done.wait [#allocation4], 32  }
 0x14f   :  { %483 = vsyncadd [#allocation4], 4294967264 }
 0x150   :  { %352 = vsyncpa [#allocation3], 1 }
 0x151   :  { %353 = vsyncpa [#allocation6], 1 }
 0x152   :  { %354 = vsyncpa [#allocation4], 1 }

</bundles_post_ra>
